<compile_context>
chip_gen: v7x
topology: tpu7x:2x2x1
jax: 0.10.0
libtpu: 0.0.40
codegen_flags: <defaults>
</compile_context>

<pallas_src>
import jax
import jax.numpy as jnp
from jax.experimental import pallas as pl
from jax.experimental.pallas import tpu as pltpu

EPS = 1e-5                                # nn.BatchNorm2d default eps
_VMEM_LIMIT = 32 * 1024 * 1024            # fits scoped-VMEM defaults on v5e/v6e/v7x
_TILE_BYTES_BUDGET = 4 * 1024 * 1024      # per-tile (x + out) budget; x2 double buffering


def _pick_tile_p(p_total, cin, cout):
    """Largest pixel-tile (lane dim) that keeps double-buffered tiles well inside
    VMEM on all chip generations; multiple of 128 lanes when tiling is needed."""
    max_p = max(128, _TILE_BYTES_BUDGET // (4 * (cin + cout)))
    if p_total <= max_p:
        return p_total                      # whole per-image plane fits in one tile
    for p in range(max_p - (max_p % 128), 0, -128):
        if p_total % p == 0:
            return p
    # No 128-multiple divisor: fall back to the full plane (still correct).
    return p_total


def _conv_tile(w, x):
    """1x1 conv on one pixel tile: (Cout, Cin) @ (Cin, P) -> (Cout, P) in f32."""
    cout, cin = w.shape
    if cin <= 16:
        # Tiny contraction (toy Cin=4, Cout=8): the MXU would be <1% utilized and
        # pay wind-up latency. Unrolled per-input-channel broadcast FMAs on the VPU.
        acc = (w[:, 0:1] * x[0:1, :]).astype(jnp.float32)
        for c in range(1, cin):
            acc = acc + w[:, c:c + 1] * x[c:c + 1, :]
        return acc
    if cin >= 128 and cout >= 128:
        # Production channel counts: bf16 MXU inputs (v6e/v7x fast path, native on
        # v5e's 128x128 MXU too); keep f32 accumulation and all BN math in f32.
        return jnp.dot(w.astype(jnp.bfloat16), x.astype(jnp.bfloat16),
                       preferred_element_type=jnp.float32)
    return jnp.dot(w, x, preferred_element_type=jnp.float32)


def _stats_kernel(x_ref, w_ref, sum_ref, sumsq_ref):
    # x_ref: (Cin, TILE_P); w_ref: (Cout, Cin)
    # sum_ref / sumsq_ref: (Cout, 1) f32 accumulators, resident across the pixel-tile
    # grid axis for a fixed image (same output block index -> accumulator pattern).
    @pl.when(pl.program_id(1) == 0)
    def _init():
        sum_ref[...] = jnp.zeros_like(sum_ref)
        sumsq_ref[...] = jnp.zeros_like(sumsq_ref)

    conv = _conv_tile(w_ref[...], x_ref[...])                 # (Cout, TILE_P) f32
    sum_ref[...] += jnp.sum(conv, axis=1, keepdims=True)
    sumsq_ref[...] += jnp.sum(conv * conv, axis=1, keepdims=True)


def _norm_kernel(x_ref, w_ref, scale_ref, shift_ref, o_ref):
    # Recompute the cheap 1x1 conv and apply the fused BN scale/shift.
    conv = _conv_tile(w_ref[...], x_ref[...])                 # (Cout, TILE_P) f32
    o_ref[...] = (conv * scale_ref[...] + shift_ref[...]).astype(o_ref.dtype)


def downsample(x_nchw, weight, bias, gamma, beta, *, eps=EPS):
    """weight: (Cout, Cin, 1, 1); bias/gamma/beta: (Cout,). Returns NCHW output.

    `bias` is accepted for API parity with nn.Conv2d(bias=True) but is not used:
    BatchNorm's batch-mean subtraction cancels a per-channel conv bias exactly.
    """
    N, Cin, H, W = x_nchw.shape
    Cout = weight.shape[0]
    Ho, Wo = (H + 1) // 2, (W + 1) // 2
    P = Ho * Wo
    M = N * P

    # The only pixels a 1x1 stride-2 conv reads. Single strided gather, no transposes;
    # the reshape to (N, Cin, Ho*Wo) is free (contiguous).
    # TODO(synk): fold this gather into the pass-1/2 BlockSpecs (strided pl.ds /
    # pl.Element row indexing) once sub-(8,128) input blocks are validated on the
    # target toolchain; that removes the last extra HBM round trip.
    xs = x_nchw[:, :, ::2, ::2].reshape(N, Cin, P)
    wmat = weight.reshape(Cout, Cin)

    tile_p = _pick_tile_p(P, Cin, Cout)
    T = P // tile_p

    x_spec = pl.BlockSpec((None, Cin, tile_p), lambda n, t: (n, 0, t))
    w_spec = pl.BlockSpec((Cout, Cin), lambda n, t: (0, 0))
    stat_spec = pl.BlockSpec((None, Cout, 1), lambda n, t: (n, 0, 0))

    # ---- Pass 1: per-channel sum / sum-of-squares of the conv output ------------
    stat_shape = jax.ShapeDtypeStruct((N, Cout, 1), jnp.float32)
    sum_p, sumsq_p = pl.pallas_call(
        _stats_kernel,
        out_shape=(stat_shape, stat_shape),
        grid=(N, T),
        in_specs=[x_spec, w_spec],
        out_specs=(stat_spec, stat_spec),
        compiler_params=pltpu.CompilerParams(
            dimension_semantics=("parallel", "arbitrary"),
            vmem_limit_bytes=_VMEM_LIMIT),
        cost_estimate=pl.CostEstimate(
            flops=2 * M * Cin * Cout + 4 * M * Cout,
            transcendentals=0,
            bytes_accessed=4 * (M * Cin + Cout * Cin + 2 * N * Cout)),
    )(xs, wmat)

    # Finalize BN statistics (tiny per-channel math) and fold gamma/beta/mean/var
    # into a single per-channel scale & shift. Biased batch variance (training mode).
    s = jnp.sum(sum_p, axis=0)[:, 0]          # (Cout,)
    ss = jnp.sum(sumsq_p, axis=0)[:, 0]       # (Cout,)
    mean = s / M
    var = jnp.maximum(ss / M - mean * mean, 0.0)
    inv = jax.lax.rsqrt(var + eps)
    scale = (gamma * inv).astype(jnp.float32).reshape(Cout, 1)
    shift = (beta - mean * gamma * inv).astype(jnp.float32).reshape(Cout, 1)

    # ---- Pass 2: conv + fused scale/shift, lane-dense (Cout, TILE_P) tiles -------
    out_flat = pl.pallas_call(
        _norm_kernel,
        out_shape=jax.ShapeDtypeStruct((N, Cout, P), x_nchw.dtype),
        grid=(N, T),
        in_specs=[
            x_spec,
            w_spec,
            pl.BlockSpec((Cout, 1), lambda n, t: (0, 0)),
            pl.BlockSpec((Cout, 1), lambda n, t: (0, 0)),
        ],
        out_specs=pl.BlockSpec((None, Cout, tile_p), lambda n, t: (n, 0, t)),
        compiler_params=pltpu.CompilerParams(
            dimension_semantics=("parallel", "parallel"),
            vmem_limit_bytes=_VMEM_LIMIT),
        cost_estimate=pl.CostEstimate(
            flops=2 * M * Cin * Cout + 2 * M * Cout,
            transcendentals=0,
            bytes_accessed=4 * (M * Cin + M * Cout + Cout * (Cin + 2))),
    )(xs, wmat, scale, shift)

    return out_flat.reshape(N, Cout, Ho, Wo)        # free reshape (contiguous)


def reference(x_nchw, weight, bias, gamma, beta, eps=EPS):
    # Pure-JAX mirror of Conv2d(1x1, stride 2, bias) + BatchNorm2d (training stats).
    xs = x_nchw[:, :, ::2, ::2]
    conv = jnp.einsum("nchw,oc->nohw", xs, weight.reshape(weight.shape[0], -1)) \
        + bias[None, :, None, None]
    mean = jnp.mean(conv, axis=(0, 2, 3), keepdims=True)
    var = jnp.mean((conv - mean) ** 2, axis=(0, 2, 3), keepdims=True)
    return (conv - mean) * jax.lax.rsqrt(var + eps) * gamma[None, :, None, None] \
        + beta[None, :, None, None]


if __name__ == "__main__":
    in_channels, out_channels = 4, 8
    N, H, W = 2, 16, 16

    key = jax.random.PRNGKey(0)
    kx, kw, kb = jax.random.split(key, 3)

    x = jax.random.normal(kx, (N, in_channels, H, W), dtype=jnp.float32)
    weight = jax.random.normal(kw, (out_channels, in_channels, 1, 1), jnp.float32) * 0.1
    bias = jax.random.normal(kb, (out_channels,), jnp.float32) * 0.1
    gamma = jnp.ones((out_channels,), jnp.float32)     # BN weight init
    beta = jnp.zeros((out_channels,), jnp.float32)     # BN bias init

    out = jax.block_until_ready(jax.jit(downsample)(x, weight, bias, gamma, beta))
    ref = jax.block_until_ready(reference(x, weight, bias, gamma, beta))

    assert out.shape == (N, out_channels, H // 2, W // 2), out.shape
    err = float(jnp.max(jnp.abs(out - ref)))
    assert err < 1e-4, err

    print("KERNEL_OK")
</pallas_src>

<mosaic_0001>
module attributes {stable_mosaic.version = 11 : i64} {
  func.func @_stats_kernel(%arg0: i32, %arg1: i32, %arg2: memref<1x4x64xf32, #tpu.memory_space<vmem>>, %arg3: memref<8x4xf32, #tpu.memory_space<vmem>>, %arg4: memref<1x8x1xf32, #tpu.memory_space<vmem>>, %arg5: memref<1x8x1xf32, #tpu.memory_space<vmem>>) attributes {dimension_semantics = [#tpu.dimension_semantics<parallel>, #tpu.dimension_semantics<arbitrary>], iteration_bounds = array<i64: 2, 1>, scalar_prefetch = 0 : i64, scratch_operands = 0 : i64, tpu.core_type = #tpu.core_type<tc>, window_params = [{transform_indices = @transform_0, window_bounds = array<i64: 1, 4, 64>}, {pipeline_mode = #tpu.pipeline_mode<synchronous>, transform_indices = @transform_1, window_bounds = array<i64: 8, 4>}, {transform_indices = @transform_2, window_bounds = array<i64: 1, 8, 1>}, {transform_indices = @transform_3, window_bounds = array<i64: 1, 8, 1>}]} {
    %c0_i32 = arith.constant 0 : i32
    %0 = arith.cmpi eq, %arg1, %c0_i32 : i32
    %1 = arith.extui %0 : i1 to i32
    %c0_i32_0 = arith.constant 0 : i32
    %2 = arith.cmpi ne, %1, %c0_i32_0 : i32
    scf.if %2 {
      %cst_18 = arith.constant 0.000000e+00 : f32
      %46 = vector.broadcast %cst_18 : f32 to vector<8x1xf32>
      %c0_19 = arith.constant 0 : index
      %c0_20 = arith.constant 0 : index
      %c0_21 = arith.constant 0 : index
      %47 = vector.load %arg4[%c0_19, %c0_20, %c0_21] : memref<1x8x1xf32, #tpu.memory_space<vmem>>, vector<1x8x1xf32>
      %48 = vector.shape_cast %47 : vector<1x8x1xf32> to vector<8x1xf32>
      %49 = vector.shape_cast %46 : vector<8x1xf32> to vector<1x8x1xf32>
      tpu.vector_store %arg4[%c0_19, %c0_20, %c0_21], %49 {strides = array<i32>} : memref<1x8x1xf32, #tpu.memory_space<vmem>>, vector<1x8x1xf32>,
      %cst_22 = arith.constant 0.000000e+00 : f32
      %50 = vector.broadcast %cst_22 : f32 to vector<8x1xf32>
      %c0_23 = arith.constant 0 : index
      %c0_24 = arith.constant 0 : index
      %c0_25 = arith.constant 0 : index
      %51 = vector.load %arg5[%c0_23, %c0_24, %c0_25] : memref<1x8x1xf32, #tpu.memory_space<vmem>>, vector<1x8x1xf32>
      %52 = vector.shape_cast %51 : vector<1x8x1xf32> to vector<8x1xf32>
      %53 = vector.shape_cast %50 : vector<8x1xf32> to vector<1x8x1xf32>
      tpu.vector_store %arg5[%c0_23, %c0_24, %c0_25], %53 {strides = array<i32>} : memref<1x8x1xf32, #tpu.memory_space<vmem>>, vector<1x8x1xf32>,
    } else {
    }
    %c0 = arith.constant 0 : index
    %c0_1 = arith.constant 0 : index
    %3 = vector.load %arg3[%c0, %c0_1] : memref<8x4xf32, #tpu.memory_space<vmem>>, vector<8x4xf32>
    %c0_2 = arith.constant 0 : index
    %c0_3 = arith.constant 0 : index
    %c0_4 = arith.constant 0 : index
    %4 = vector.load %arg2[%c0_2, %c0_3, %c0_4] : memref<1x4x64xf32, #tpu.memory_space<vmem>>, vector<1x4x64xf32>
    %5 = vector.shape_cast %4 : vector<1x4x64xf32> to vector<4x64xf32>
    %6 = vector.extract_strided_slice %3 {offsets = [0, 0], sizes = [8, 1], strides = [1, 1]} : vector<8x4xf32> to vector<8x1xf32>
    %7 = vector.extract_strided_slice %5 {offsets = [0, 0], sizes = [1, 64], strides = [1, 1]} : vector<4x64xf32> to vector<1x64xf32>
    %8 = vector.broadcast %6 : vector<8x1xf32> to vector<8x64xf32>
    %9 = vector.broadcast %7 : vector<1x64xf32> to vector<8x64xf32>
    %10 = arith.mulf %8, %9 : vector<8x64xf32>
    %11 = vector.extract_strided_slice %3 {offsets = [0, 1], sizes = [8, 1], strides = [1, 1]} : vector<8x4xf32> to vector<8x1xf32>
    %12 = vector.extract_strided_slice %5 {offsets = [1, 0], sizes = [1, 64], strides = [1, 1]} : vector<4x64xf32> to vector<1x64xf32>
    %13 = vector.broadcast %11 : vector<8x1xf32> to vector<8x64xf32>
    %14 = vector.broadcast %12 : vector<1x64xf32> to vector<8x64xf32>
    %15 = arith.mulf %13, %14 : vector<8x64xf32>
    %16 = arith.addf %10, %15 : vector<8x64xf32>
    %17 = vector.extract_strided_slice %3 {offsets = [0, 2], sizes = [8, 1], strides = [1, 1]} : vector<8x4xf32> to vector<8x1xf32>
    %18 = vector.extract_strided_slice %5 {offsets = [2, 0], sizes = [1, 64], strides = [1, 1]} : vector<4x64xf32> to vector<1x64xf32>
    %19 = vector.broadcast %17 : vector<8x1xf32> to vector<8x64xf32>
    %20 = vector.broadcast %18 : vector<1x64xf32> to vector<8x64xf32>
    %21 = arith.mulf %19, %20 : vector<8x64xf32>
    %22 = arith.addf %16, %21 : vector<8x64xf32>
    %23 = vector.extract_strided_slice %3 {offsets = [0, 3], sizes = [8, 1], strides = [1, 1]} : vector<8x4xf32> to vector<8x1xf32>
    %24 = vector.extract_strided_slice %5 {offsets = [3, 0], sizes = [1, 64], strides = [1, 1]} : vector<4x64xf32> to vector<1x64xf32>
    %25 = vector.broadcast %23 : vector<8x1xf32> to vector<8x64xf32>
    %26 = vector.broadcast %24 : vector<1x64xf32> to vector<8x64xf32>
    %27 = arith.mulf %25, %26 : vector<8x64xf32>
    %28 = arith.addf %22, %27 : vector<8x64xf32>
    %c0_5 = arith.constant 0 : index
    %c0_6 = arith.constant 0 : index
    %c0_7 = arith.constant 0 : index
    %29 = vector.load %arg4[%c0_5, %c0_6, %c0_7] : memref<1x8x1xf32, #tpu.memory_space<vmem>>, vector<1x8x1xf32>
    %30 = vector.shape_cast %29 : vector<1x8x1xf32> to vector<8x1xf32>
    %cst = arith.constant dense<0.000000e+00> : vector<8xf32>
    %31 = vector.multi_reduction <add>, %28, %cst [1] : vector<8x64xf32> to vector<8xf32>
    %32 = vector.shape_cast %31 : vector<8xf32> to vector<8x1xf32>
    %33 = arith.addf %30, %32 : vector<8x1xf32>
    %c0_8 = arith.constant 0 : index
    %c0_9 = arith.constant 0 : index
    %c0_10 = arith.constant 0 : index
    %34 = vector.load %arg4[%c0_8, %c0_9, %c0_10] : memref<1x8x1xf32, #tpu.memory_space<vmem>>, vector<1x8x1xf32>
    %35 = vector.shape_cast %34 : vector<1x8x1xf32> to vector<8x1xf32>
    %36 = vector.shape_cast %33 : vector<8x1xf32> to vector<1x8x1xf32>
    tpu.vector_store %arg4[%c0_8, %c0_9, %c0_10], %36 {strides = array<i32>} : memref<1x8x1xf32, #tpu.memory_space<vmem>>, vector<1x8x1xf32>,
    %c0_11 = arith.constant 0 : index
    %c0_12 = arith.constant 0 : index
    %c0_13 = arith.constant 0 : index
    %37 = vector.load %arg5[%c0_11, %c0_12, %c0_13] : memref<1x8x1xf32, #tpu.memory_space<vmem>>, vector<1x8x1xf32>
    %38 = vector.shape_cast %37 : vector<1x8x1xf32> to vector<8x1xf32>
    %39 = arith.mulf %28, %28 : vector<8x64xf32>
    %cst_14 = arith.constant dense<0.000000e+00> : vector<8xf32>
    %40 = vector.multi_reduction <add>, %39, %cst_14 [1] : vector<8x64xf32> to vector<8xf32>
    %41 = vector.shape_cast %40 : vector<8xf32> to vector<8x1xf32>
    %42 = arith.addf %38, %41 : vector<8x1xf32>
    %c0_15 = arith.constant 0 : index
    %c0_16 = arith.constant 0 : index
    %c0_17 = arith.constant 0 : index
    %43 = vector.load %arg5[%c0_15, %c0_16, %c0_17] : memref<1x8x1xf32, #tpu.memory_space<vmem>>, vector<1x8x1xf32>
    %44 = vector.shape_cast %43 : vector<1x8x1xf32> to vector<8x1xf32>
    %45 = vector.shape_cast %42 : vector<8x1xf32> to vector<1x8x1xf32>
    tpu.vector_store %arg5[%c0_15, %c0_16, %c0_17], %45 {strides = array<i32>} : memref<1x8x1xf32, #tpu.memory_space<vmem>>, vector<1x8x1xf32>,
    return
  }
  func.func @transform_0(%arg0: i32, %arg1: i32) -> (i32, i32, i32) {
    %c0_i32 = arith.constant 0 : i32
    %c0_i32_0 = arith.constant 0 : i32
    return %arg0, %c0_i32, %arg1 : i32, i32, i32
  }
  func.func @transform_1(%arg0: i32, %arg1: i32) -> (i32, i32) {
    %c0_i32 = arith.constant 0 : i32
    %c0_i32_0 = arith.constant 0 : i32
    %c0_i32_1 = arith.constant 0 : i32
    return %c0_i32, %c0_i32_0 : i32, i32
  }
  func.func @transform_2(%arg0: i32, %arg1: i32) -> (i32, i32, i32) {
    %c0_i32 = arith.constant 0 : i32
    %c0_i32_0 = arith.constant 0 : i32
    %c0_i32_1 = arith.constant 0 : i32
    return %arg0, %c0_i32, %c0_i32_0 : i32, i32, i32
  }
  func.func @transform_3(%arg0: i32, %arg1: i32) -> (i32, i32, i32) {
    %c0_i32 = arith.constant 0 : i32
    %c0_i32_0 = arith.constant 0 : i32
    %c0_i32_1 = arith.constant 0 : i32
    return %arg0, %c0_i32, %c0_i32_0 : i32, i32, i32
  }
}

module attributes {stable_mosaic.version = 11 : i64} {
  func.func @_norm_kernel(%arg0: i32, %arg1: i32, %arg2: memref<1x4x64xf32, #tpu.memory_space<vmem>>, %arg3: memref<8x4xf32, #tpu.memory_space<vmem>>, %arg4: memref<8x1xf32, #tpu.memory_space<vmem>>, %arg5: memref<8x1xf32, #tpu.memory_space<vmem>>, %arg6: memref<1x8x64xf32, #tpu.memory_space<vmem>>) attributes {dimension_semantics = [#tpu.dimension_semantics<parallel>, #tpu.dimension_semantics<parallel>], iteration_bounds = array<i64: 2, 1>, scalar_prefetch = 0 : i64, scratch_operands = 0 : i64, tpu.core_type = #tpu.core_type<tc>, window_params = [{transform_indices = @transform_0, window_bounds = array<i64: 1, 4, 64>}, {pipeline_mode = #tpu.pipeline_mode<synchronous>, transform_indices = @transform_1, window_bounds = array<i64: 8, 4>}, {pipeline_mode = #tpu.pipeline_mode<synchronous>, transform_indices = @transform_2, window_bounds = array<i64: 8, 1>}, {pipeline_mode = #tpu.pipeline_mode<synchronous>, transform_indices = @transform_3, window_bounds = array<i64: 8, 1>}, {transform_indices = @transform_4, window_bounds = array<i64: 1, 8, 64>}]} {
    %c0 = arith.constant 0 : index
    %c0_0 = arith.constant 0 : index
    %0 = vector.load %arg3[%c0, %c0_0] : memref<8x4xf32, #tpu.memory_space<vmem>>, vector<8x4xf32>
    %c0_1 = arith.constant 0 : index
    %c0_2 = arith.constant 0 : index
    %c0_3 = arith.constant 0 : index
    %1 = vector.load %arg2[%c0_1, %c0_2, %c0_3] : memref<1x4x64xf32, #tpu.memory_space<vmem>>, vector<1x4x64xf32>
    %2 = vector.shape_cast %1 : vector<1x4x64xf32> to vector<4x64xf32>
    %3 = vector.extract_strided_slice %0 {offsets = [0, 0], sizes = [8, 1], strides = [1, 1]} : vector<8x4xf32> to vector<8x1xf32>
    %4 = vector.extract_strided_slice %2 {offsets = [0, 0], sizes = [1, 64], strides = [1, 1]} : vector<4x64xf32> to vector<1x64xf32>
    %5 = vector.broadcast %3 : vector<8x1xf32> to vector<8x64xf32>
    %6 = vector.broadcast %4 : vector<1x64xf32> to vector<8x64xf32>
    %7 = arith.mulf %5, %6 : vector<8x64xf32>
    %8 = vector.extract_strided_slice %0 {offsets = [0, 1], sizes = [8, 1], strides = [1, 1]} : vector<8x4xf32> to vector<8x1xf32>
    %9 = vector.extract_strided_slice %2 {offsets = [1, 0], sizes = [1, 64], strides = [1, 1]} : vector<4x64xf32> to vector<1x64xf32>
    %10 = vector.broadcast %8 : vector<8x1xf32> to vector<8x64xf32>
    %11 = vector.broadcast %9 : vector<1x64xf32> to vector<8x64xf32>
    %12 = arith.mulf %10, %11 : vector<8x64xf32>
    %13 = arith.addf %7, %12 : vector<8x64xf32>
    %14 = vector.extract_strided_slice %0 {offsets = [0, 2], sizes = [8, 1], strides = [1, 1]} : vector<8x4xf32> to vector<8x1xf32>
    %15 = vector.extract_strided_slice %2 {offsets = [2, 0], sizes = [1, 64], strides = [1, 1]} : vector<4x64xf32> to vector<1x64xf32>
    %16 = vector.broadcast %14 : vector<8x1xf32> to vector<8x64xf32>
    %17 = vector.broadcast %15 : vector<1x64xf32> to vector<8x64xf32>
    %18 = arith.mulf %16, %17 : vector<8x64xf32>
    %19 = arith.addf %13, %18 : vector<8x64xf32>
    %20 = vector.extract_strided_slice %0 {offsets = [0, 3], sizes = [8, 1], strides = [1, 1]} : vector<8x4xf32> to vector<8x1xf32>
    %21 = vector.extract_strided_slice %2 {offsets = [3, 0], sizes = [1, 64], strides = [1, 1]} : vector<4x64xf32> to vector<1x64xf32>
    %22 = vector.broadcast %20 : vector<8x1xf32> to vector<8x64xf32>
    %23 = vector.broadcast %21 : vector<1x64xf32> to vector<8x64xf32>
    %24 = arith.mulf %22, %23 : vector<8x64xf32>
    %25 = arith.addf %19, %24 : vector<8x64xf32>
    %c0_4 = arith.constant 0 : index
    %c0_5 = arith.constant 0 : index
    %26 = vector.load %arg4[%c0_4, %c0_5] : memref<8x1xf32, #tpu.memory_space<vmem>>, vector<8x1xf32>
    %27 = vector.broadcast %26 : vector<8x1xf32> to vector<8x64xf32>
    %28 = arith.mulf %25, %27 : vector<8x64xf32>
    %c0_6 = arith.constant 0 : index
    %c0_7 = arith.constant 0 : index
    %29 = vector.load %arg5[%c0_6, %c0_7] : memref<8x1xf32, #tpu.memory_space<vmem>>, vector<8x1xf32>
    %30 = vector.broadcast %29 : vector<8x1xf32> to vector<8x64xf32>
    %31 = arith.addf %28, %30 : vector<8x64xf32>
    %c0_8 = arith.constant 0 : index
    %c0_9 = arith.constant 0 : index
    %c0_10 = arith.constant 0 : index
    %32 = vector.load %arg6[%c0_8, %c0_9, %c0_10] : memref<1x8x64xf32, #tpu.memory_space<vmem>>, vector<1x8x64xf32>
    %33 = vector.shape_cast %32 : vector<1x8x64xf32> to vector<8x64xf32>
    %34 = vector.shape_cast %31 : vector<8x64xf32> to vector<1x8x64xf32>
    tpu.vector_store %arg6[%c0_8, %c0_9, %c0_10], %34 {strides = array<i32>} : memref<1x8x64xf32, #tpu.memory_space<vmem>>, vector<1x8x64xf32>,
    return
  }
  func.func @transform_0(%arg0: i32, %arg1: i32) -> (i32, i32, i32) {
    %c0_i32 = arith.constant 0 : i32
    %c0_i32_0 = arith.constant 0 : i32
    return %arg0, %c0_i32, %arg1 : i32, i32, i32
  }
  func.func @transform_1(%arg0: i32, %arg1: i32) -> (i32, i32) {
    %c0_i32 = arith.constant 0 : i32
    %c0_i32_0 = arith.constant 0 : i32
    %c0_i32_1 = arith.constant 0 : i32
    return %c0_i32, %c0_i32_0 : i32, i32
  }
  func.func @transform_2(%arg0: i32, %arg1: i32) -> (i32, i32) {
    %c0_i32 = arith.constant 0 : i32
    %c0_i32_0 = arith.constant 0 : i32
    %c0_i32_1 = arith.constant 0 : i32
    return %c0_i32, %c0_i32_0 : i32, i32
  }
  func.func @transform_3(%arg0: i32, %arg1: i32) -> (i32, i32) {
    %c0_i32 = arith.constant 0 : i32
    %c0_i32_0 = arith.constant 0 : i32
    %c0_i32_1 = arith.constant 0 : i32
    return %c0_i32, %c0_i32_0 : i32, i32
  }
  func.func @transform_4(%arg0: i32, %arg1: i32) -> (i32, i32, i32) {
    %c0_i32 = arith.constant 0 : i32
    %c0_i32_0 = arith.constant 0 : i32
    return %arg0, %c0_i32, %arg1 : i32, i32, i32
  }
}

</mosaic_0001>

<bundles_post_ra>
// kernel: downsample.2
= control target key start
LH: loop header
LB: loop body
LE: loop exit
PB: predicated region body
PF: predicated region fallthrough
CT: control target
= control target key end

     0   :  { %s452_s12 = smov 0   ;;  %s454_s13 = smov 0   ;;  %s508_s0 = inlined_call_operand.vmem [shape: f32[2,4,64], index: 0, kind: input, shape index: {}]   ;;  %s509_s1 = inlined_call_operand.vmem [shape: f32[8,4], index: 1, kind: input, shape index: {}]   ;;  %s510_s2 = inlined_call_operand.vmem [shape: f32[2,8,1], index: 2, kind: output, shape index: {0}]   ;;  %s511_s3 = inlined_call_operand.vmem [shape: f32[2,8,1], index: 3, kind: output, shape index: {1}]  }
   0x1   :  { %s456_s14 = smov 0  }
   0x2 LB: > { %s26_s15 = sadd.s32 1, %s421_s13  ;;  %p363_p0 = scmp.ge.s32.totalorder %s425_s14, 1  ;;  %s425_s14 = sphi %s456_s14, %s14_s14   ;;  %s421_s13 = sphi %s454_s13, %s513_s13   ;;  %s417_s12 = sphi %s452_s12, %s512_s12  }
   0x3   : > { %p28_p1 = scmp.ge.s32.totalorder %s26_s15, 2  ;;  %p156_p2 = scmp.lt.s32.totalorder %s425_s14, 3 }
   0x5   : > { %s515_s15 = smov (%p28_p1, %s26_s15), 0  ;;  %p157_p3 = pnand %p363_p0, %p156_p2 }
   0x6   : > { %v207_v0 = vld [vmem:[%s509_s1] sm:$0xff] (!%p157_p3)  ;;  %v427_v1 = vmov (!%p157_p3), 0   ;;  %v428_v2 = vmov (!%p157_p3), 2   ;;  %v429_v3 = vmov (!%p157_p3), 1   ;;  %v430_v4 = vmov (!%p157_p3), 3   ;;  %p185_p4 = scmp.lt.s32.totalorder (!%p157_p3), %s417_s12, 1 }
   0x7   : > { %160 = sbr.rel (%p157_p3) target bundleno = 297 (0x129), region = 28  ;;  %398 = vset.pattern.permute.xlu0 (!%p157_p3), %v427_v1  ;;  %400 = vset.pattern.permute.xlu1 (!%p157_p3), %v428_v2  ;;  %vm204_vm0 = vcmask (!%p157_p3), 7168   ;;  %v431_v5 = vmov (!%p157_p3), 0.0   ;;  %v214_v6 = vlaneseq (!%p157_p3)  ;;  %vm250_vm1 = vcmask (!%p157_p3), 523264  }
   0x8   : > { %211 = vperm.xlu0 (!%p157_p3), %398, %v207_v0   ;;  %230 = vperm.xlu1 (!%p157_p3), %400, %v207_v0  }
   0x9   : > { %v215_v7 = vshrl.u32 (!%p157_p3), %v214_v6, 7 }
   0xb   : > { %v216_v8 = vsub.s32 (!%p157_p3), 0, %v215_v7  ;;  %v225_v9 = vsub.s32 (!%p157_p3), 1, %v215_v7  ;;  %v235_v12 = vsub.s32 (!%p157_p3), 2, %v215_v7  ;;  %v245_v14 = vsub.s32 (!%p157_p3), 3, %v215_v7 }
   0xc   : > { %399 = vset.pattern.permute.xlu0 (!%p157_p3), %v429_v3  ;;  %401 = vset.pattern.permute.xlu1 (!%p157_p3), %v430_v4 }
   0xd   : > { %220 = vperm.xlu0 (!%p157_p3), %399, %v207_v0   ;;  %240 = vperm.xlu1 (!%p157_p3), %401, %v207_v0  }
   0xe   : > { %s517_s12 = smov (!%p185_p4, %s417_s12), 1 }
   0xf   : > { %s365_s18 = sshll.u32 %s517_s12, 3  ;;  %s364_s22 = sshll.u32 %s517_s12, 2 }
  0x10   : > { %s481_s21 = scalar_lea.vmem %s510_s2, %s365_s18  ;;  %s191_s25 = scalar_lea.vmem %s508_s0, %s364_s22 }
  0x11   : > { %402 = vset.pattern.permute.xlu0 %v430_v4  ;;  %205 = vst.msk [vmem:[%s481_s21] sm:$0xff] %vm204_vm0, %v431_v5  ;;  %v208_v10 = vld [vmem:[%s191_s25] sm:$0xf]  ;;  %s199_s28 = scalar_lea.vmem %s511_s3, %s365_s18 }
  0x12   : > { %v217_v15 = vrot.slane %v208_v10, %v216_v8  ;;  %v226_v16 = vrot.slane %v208_v10, %v225_v9  ;;  %v236_v17 = vrot.slane %v208_v10, %v235_v12  ;;  %v246_v18 = vrot.slane %v208_v10, %v245_v14  ;;  %206 = vst.msk [vmem:[%s199_s28] sm:$0xff] %vm204_vm0, %v431_v5 }
  0x18   : > { %v249_v31 = vld [vmem:[%s481_s21] sm:$0xff] }
  0x19   : > { %v257_v33 = vld [vmem:[%s199_s28] sm:$0xff] }
  0x87   : > { %v212_v11 = vpop.permute.xlu0 %211  ;;  %v231_v13 = vpop.permute.xlu1 %230 }
  0x88   : > { %v218_v21 = vmul.f32 %v217_v15, %v212_v11  ;;  %v237_v23 = vmul.f32 %v236_v17, %v231_v13 }
  0x8c   : > { %v221_v19 = vpop.permute.xlu0 %220  ;;  %v241_v20 = vpop.permute.xlu1 %240 }
  0x8d   : > { %v227_v22 = vmul.f32 %v226_v16, %v221_v19  ;;  %v247_v25 = vmul.f32 %v246_v18, %v241_v20 }
  0x8f   : > { %v228_v24 = vadd.f32 %v227_v22, %v218_v21 }
  0x91   : > { %v238_v26 = vadd.f32 %v237_v23, %v228_v24 }
  0x93   : > { %v248_v27 = vadd.f32 %v247_v25, %v238_v26 }
  0x95   : > { %v251_v28 = vsel %vm250_vm1, %v248_v27, 0.0  ;;  %v258_v29 = vmul.f32 %v248_v27, %v248_v27 }
  0x96   : > { %252 = vadd.xlane.f32.xlu1 %v251_v28 }
  0x97   : > { %v259_v30 = vsel %vm250_vm1, %v258_v29, 0.0 }
  0x98   : > { %260 = vadd.xlane.f32.xlu0 %v259_v30 }
 0x123   : > { %v253_v32 = vpop.xlane.xlu1 %252 }
 0x124   : > { %v254_v34 = vadd.f32 %v253_v32, %v249_v31 }
 0x125   : > { %v261_v35 = vpop.xlane.xlu0 %260 }
 0x126   : > { %256 = vst.msk [vmem:[%s481_s21] sm:$0xff] %vm204_vm0, %v254_v34  ;;  %v262_v36 = vadd.f32 %v261_v35, %v257_v33 }
 0x128   : > { %263 = vst.msk [vmem:[%s199_s28] sm:$0xff] %vm204_vm0, %v262_v36 }
 0x129 PF: > { %s14_s14 = sadd.s32 1, %s425_s14   ;;  %s512_s12 = smov %s421_s13 }
 0x12a   : > { %p11_p5 = scmp.ge.s32.totalorder %s14_s14, 4   ;;  %s513_s13 = smov %s515_s15 }
 0x12c   :  { %13 = sbr.rel (!%p11_p5) target bundleno = 2 (0x2), region = 74 }

// kernel: downsample.3
= control target key start
LH: loop header
LB: loop body
LE: loop exit
PB: predicated region body
PF: predicated region fallthrough
CT: control target
= control target key end

     0   :  { %s452_s15 = smov 0   ;;  %s454_s16 = smov 0   ;;  %s502_s0 = inlined_call_operand.vmem [shape: f32[2,4,64], index: 0, kind: input, shape index: {}]   ;;  %s503_s1 = inlined_call_operand.vmem [shape: f32[8,4], index: 1, kind: input, shape index: {}]   ;;  %s504_s2 = inlined_call_operand.vmem [shape: f32[8,1], index: 2, kind: input, shape index: {}]   ;;  %s505_s3 = inlined_call_operand.vmem [shape: f32[8,1], index: 3, kind: input, shape index: {}]   ;;  %s506_s4 = inlined_call_operand.vmem [shape: f32[2,8,64], index: 4, kind: output, shape index: {}]  }
   0x1   :  { %s456_s17 = smov 0  }
   0x2 LB: > { %s26_s18 = sadd.s32 1, %s417_s16  ;;  %p360_p0 = scmp.ge.s32.totalorder %s421_s17, 1  ;;  %s421_s17 = sphi %s456_s17, %s14_s17   ;;  %s417_s16 = sphi %s454_s16, %s508_s16   ;;  %s413_s15 = sphi %s452_s15, %s507_s15  }
   0x3   : > { %p28_p1 = scmp.ge.s32.totalorder %s26_s18, 2  ;;  %p180_p2 = scmp.lt.s32.totalorder %s421_s17, 3 }
   0x5   : > { %s510_s18 = smov (%p28_p1, %s26_s18), 0  ;;  %p181_p3 = pnand %p360_p0, %p180_p2 }
   0x6   : > { %v224_v0 = vld [vmem:[%s503_s1] sm:$0xff] (!%p181_p3)  ;;  %v423_v1 = vmov (!%p181_p3), 0   ;;  %v424_v2 = vmov (!%p181_p3), 2   ;;  %v425_v3 = vmov (!%p181_p3), 1   ;;  %v426_v4 = vmov (!%p181_p3), 3   ;;  %p210_p4 = scmp.lt.s32.totalorder (!%p181_p3), %s413_s15, 1 }
   0x7   : > { %184 = sbr.rel (%p181_p3) target bundleno = 154 (0x9a), region = 36  ;;  %393 = vset.pattern.permute.xlu0 (!%p181_p3), %v423_v1  ;;  %395 = vset.pattern.permute.xlu1 (!%p181_p3), %v424_v2  ;;  %v266_v5 = vld [vmem:[%s504_s2] sm:$0xff] (!%p181_p3)  ;;  %v231_v7 = vlaneseq (!%p181_p3)  ;;  %vm280_vm0 = vcmask (!%p181_p3), 523264  }
   0x8   : > { %228 = vperm.xlu0 (!%p181_p3), %393, %v224_v0   ;;  %247 = vperm.xlu1 (!%p181_p3), %395, %v224_v0   ;;  %v273_v6 = vld [vmem:[%s505_s3] sm:$0xff] (!%p181_p3) }
   0x9   : > { %v232_v8 = vshrl.u32 (!%p181_p3), %v231_v7, 7 }
   0xb   : > { %v233_v9 = vsub.s32 (!%p181_p3), 0, %v232_v8  ;;  %v242_v10 = vsub.s32 (!%p181_p3), 1, %v232_v8  ;;  %v252_v13 = vsub.s32 (!%p181_p3), 2, %v232_v8  ;;  %v262_v15 = vsub.s32 (!%p181_p3), 3, %v232_v8 }
   0xc   : > { %394 = vset.pattern.permute.xlu0 (!%p181_p3), %v425_v3  ;;  %396 = vset.pattern.permute.xlu1 (!%p181_p3), %v426_v4 }
   0xd   : > { %237 = vperm.xlu0 (!%p181_p3), %394, %v224_v0   ;;  %257 = vperm.xlu1 (!%p181_p3), %396, %v224_v0  }
   0xe   : > { %s512_s15 = smov (!%p210_p4, %s413_s15), 1 }
   0xf   : > { %s361_s25 = sshll.u32 %s512_s15, 2  ;;  %s362_s29 = sshll.u32 %s512_s15, 3 }
  0x10   : > { %s216_s28 = scalar_lea.vmem %s502_s0, %s361_s25  ;;  %s223_s6 = scalar_lea.vmem %s506_s4, %s362_s29 }
  0x11   : > { %397 = vset.pattern.permute.xlu1 %v423_v1  ;;  %398 = vset.pattern.permute.xlu0 %v423_v1  ;;  %v225_v11 = vld [vmem:[%s216_s28] sm:$0xf] }
  0x12   : > { %269 = vperm.xlu1 %397, %v266_v5   ;;  %276 = vperm.xlu0 %398, %v273_v6   ;;  %v234_v16 = vrot.slane %v225_v11, %v233_v9  ;;  %v243_v17 = vrot.slane %v225_v11, %v242_v10  ;;  %v253_v18 = vrot.slane %v225_v11, %v252_v13 }
  0x13   : > { %v263_v19 = vrot.slane %v225_v11, %v262_v15 }
  0x87   : > { %v229_v12 = vpop.permute.xlu0 %228  ;;  %v248_v14 = vpop.permute.xlu1 %247 }
  0x88   : > { %v235_v22 = vmul.f32 %v234_v16, %v229_v12  ;;  %v254_v24 = vmul.f32 %v253_v18, %v248_v14 }
  0x8c   : > { %v238_v20 = vpop.permute.xlu0 %237  ;;  %v258_v21 = vpop.permute.xlu1 %257 }
  0x8d   : > { %v244_v23 = vmul.f32 %v243_v17, %v238_v20  ;;  %v264_v26 = vmul.f32 %v263_v19, %v258_v21 }
  0x8f   : > { %v245_v25 = vadd.f32 %v244_v23, %v235_v22 }
  0x91   : > { %v255_v27 = vadd.f32 %v254_v24, %v245_v25  ;;  %v270_v28 = vpop.permute.xlu1 %269  ;;  %v277_v30 = vpop.permute.xlu0 %276 }
  0x93   : > { %v265_v29 = vadd.f32 %v264_v26, %v255_v27 }
  0x95   : > { %v272_v31 = vmul.f32 %v270_v28, %v265_v29 }
  0x97   : > { %v279_v32 = vadd.f32 %v277_v30, %v272_v31 }
  0x99   : > { %281 = vst.msk [vmem:[%s223_s6] sm:$0xff] %vm280_vm0, %v279_v32 }
  0x9a PF: > { %s14_s17 = sadd.s32 1, %s421_s17   ;;  %s507_s15 = smov %s417_s16 }
  0x9b   : > { %p11_p5 = scmp.ge.s32.totalorder %s14_s17, 4   ;;  %s508_s16 = smov %s510_s18 }
  0x9d   :  { %13 = sbr.rel (!%p11_p5) target bundleno = 2 (0x2), region = 66 }

</bundles_post_ra>
